<compile_context>
chip_gen: v6e
topology: v6e:2x2x1
jax: 0.10.0
libtpu: 0.0.40
codegen_flags: <defaults>
</compile_context>

<pallas_src>
import functools

import numpy as np
import jax
import jax.numpy as jnp
from jax import lax
from jax.experimental import pallas as pl
from jax.experimental.pallas import tpu as pltpu


# --------------------------------------------------------------------------- #
# Parameter packing: one contiguous bf16 blob
# --------------------------------------------------------------------------- #
def _pad2d(a, rows, cols):
    a = np.asarray(a, np.float32)
    out = np.zeros((rows, cols), np.float32)
    out[: a.shape[0], : a.shape[1]] = a
    return out


def pack_params(params, *, S, H, C, F, v_rows):
    """Pack all parameters into ONE contiguous bf16 blob of shape (5*F+v_rows, F).

    Rows [i*F, (i+1)*F) hold weight slab i, zero-padded to (F, F):
        0: w1 (S,S)   1: w2 (S,H)   2: w3 (H,2)
        3: w45 (C,S) = w4 @ w5   (fold; the tanh between lin4/lin5 is dead code)
        4: w6 (S,S)
    Rows [5*F, 5*F+v_rows) hold the 1-row vectors, each zero-padded to width F:
        0: wc[0]  1: wc[1]  2: b1  3: b2  4: b3  5: bc
        6: gamma  7: beta   8: b45 9: b6   (remaining rows: zero padding)
    """
    del H, C  # widths handled by zero padding to F
    w4 = np.asarray(params["w4"], np.float64)
    w5 = np.asarray(params["w5"], np.float64)
    b4 = np.asarray(params["b4"], np.float64)
    b5 = np.asarray(params["b5"], np.float64)
    w45 = w4 @ w5
    b45 = b4 @ w5 + b5

    slabs = [
        _pad2d(params["w1"], F, F),
        _pad2d(params["w2"], F, F),
        _pad2d(params["w3"], F, F),
        _pad2d(w45, F, F),
        _pad2d(params["w6"], F, F),
    ]

    wc = np.asarray(params["wc"], np.float32)
    vec_list = [
        wc[0:1, :], wc[1:2, :],
        params["b1"], params["b2"], params["b3"], params["bc"],
        params["gamma"], params["beta"], b45, params["b6"],
    ]
    vrows = np.zeros((v_rows, F), np.float32)
    for i, v in enumerate(vec_list):
        v = np.asarray(v, np.float32).reshape(1, -1)
        vrows[i, : v.shape[1]] = v[0]

    blob_f32 = np.concatenate(slabs + [vrows], axis=0)   # (5*F + v_rows, F)
    return jnp.asarray(blob_f32).astype(jnp.bfloat16)


# --------------------------------------------------------------------------- #
# Pallas kernel
# --------------------------------------------------------------------------- #
def build_comm_16_1_forward(N, B, S, F, v_rows):
    W_ROWS = 5 * F
    P_ROWS = W_ROWS + v_rows
    bf16, f32 = jnp.bfloat16, jnp.float32

    def kernel(act_ref, p_ref, o_ref):
        # act_ref: (1, 2, B, F) f32 — [0]=x (lanes S.. are 0), [1]=noise (lanes C.. are 0)
        # p_ref:   (P_ROWS, F) bf16 — packed weights + vectors (VMEM-resident across grid)
        # o_ref:   (1, B, F) f32
        x = act_ref[0, 0]
        noise = act_ref[0, 1]

        # One aligned load of all 1-row parameters; cast once to f32 for VPU/EUP math.
        vecs = p_ref[W_ROWS:W_ROWS + v_rows, :].astype(f32)    # (v_rows, F)
        wc0, wc1 = vecs[0:1], vecs[1:2]
        b1, b2, b3 = vecs[2:3], vecs[3:4], vecs[4:5]
        bc = vecs[5:6]
        gamma, beta = vecs[6:7], vecs[7:8]
        b45, b6 = vecs[8:9], vecs[9:10]

        def dot(a_f32, w_bf16):
            # bf16 operands on the MXU, f32 accumulation.
            return jnp.dot(a_f32.astype(bf16), w_bf16,
                           preferred_element_type=f32)

        # lin1 + tanh  (true K = S; padded output lanes stay exactly 0)
        h = jnp.tanh(dot(x[:, 0:S], p_ref[0:S, :]) + b1)
        # lin2 + tanh
        h = jnp.tanh(dot(h, p_ref[F:2 * F, :]) + b2)
        # lin3 + tanh  (only lanes 0:2 carry data afterwards)
        h = jnp.tanh(dot(h, p_ref[2 * F:3 * F, :]) + b3)

        # lin_c as a K=2 VPU outer product: two broadcast FMAs instead of an
        # MXU matmul (skips one MXU push/pop on the serial chain).
        # TODO(synk): on v7x (MRB result buffer) re-benchmark vs a K=2 MXU dot.
        c = h[:, 0:1] * wc0 + h[:, 1:2] * wc1 + bc             # (B, F) f32

        # BatchNorm1d, training mode: per-group batch mean / biased var, eps=1e-5.
        mean = jnp.mean(c, axis=0, keepdims=True)
        d = c - mean
        var = jnp.mean(d * d, axis=0, keepdims=True)
        c = jnp.tanh(d * lax.rsqrt(var + 1e-5) * gamma + beta)

        # GaussianNoise: additive, pre-sampled deterministically outside.
        chan = c + noise

        # lin4·lin5 folded offline (dead tanh between them), then the live tanh.
        r = jnp.tanh(dot(chan, p_ref[3 * F:4 * F, :]) + b45)
        # lin6 — lane-dense full-width store; the (B, S) slice happens in the wrapper.
        o_ref[0, :, :] = dot(r, p_ref[4 * F:5 * F, :]) + b6

    flops = N * (2 * B * F * (S + 4 * F) + 16 * B * F)
    transcendentals = N * (5 * B * F + F)
    bytes_accessed = N * 3 * B * F * 4 + P_ROWS * F * 2

    return pl.pallas_call(
        kernel,
        out_shape=jax.ShapeDtypeStruct((N, B, F), jnp.float32),
        grid_spec=pltpu.PrefetchScalarGridSpec(
            num_scalar_prefetch=0,
            grid=(N,),
            in_specs=[
                pl.BlockSpec((1, 2, B, F), lambda n: (n, 0, 0, 0)),   # x + noise stack
                pl.BlockSpec((P_ROWS, F), lambda n: (0, 0)),          # param blob (resident)
            ],
            out_specs=pl.BlockSpec((1, B, F), lambda n: (n, 0, 0)),
        ),
        compiler_params=pltpu.CompilerParams(
            dimension_semantics=("parallel",)),
        cost_estimate=pl.CostEstimate(
            flops=flops,
            transcendentals=transcendentals,
            bytes_accessed=bytes_accessed),
    )


def comm_16_1_forward(x, noise, blob, *, S, C, F, v_rows):
    """x: (N, B, S) one-hot input; noise: (N, B, C) channel noise; blob: packed params."""
    N, B, _ = x.shape
    act = jnp.zeros((N, 2, B, F), jnp.float32)
    act = act.at[:, 0, :, :S].set(x.astype(jnp.float32))
    act = act.at[:, 1, :, :C].set(noise.astype(jnp.float32))
    fwd = build_comm_16_1_forward(N, B, S, F, v_rows)
    out = fwd(act, blob)                  # (N, B, F), lanes S.. are exactly 0
    return out[:, :, :S]


# --------------------------------------------------------------------------- #
# References for sanity checks
# --------------------------------------------------------------------------- #
def reference_forward_group(x, p, noise):
    """Pure f32 HIGHEST-precision, unfolded reference for ONE batch group."""
    hp = lax.Precision.HIGHEST
    h = jnp.tanh(jnp.dot(x, p["w1"], precision=hp) + p["b1"])
    h = jnp.tanh(jnp.dot(h, p["w2"], precision=hp) + p["b2"])
    h = jnp.tanh(jnp.dot(h, p["w3"], precision=hp) + p["b3"])
    h = jnp.dot(h, p["wc"], precision=hp) + p["bc"]
    mean = jnp.mean(h, axis=0, keepdims=True)
    var = jnp.mean((h - mean) ** 2, axis=0, keepdims=True)
    h = (h - mean) * lax.rsqrt(var + 1e-5) * p["gamma"] + p["beta"]
    h = jnp.tanh(h)
    chan = h + noise
    r = jnp.dot(chan, p["w4"], precision=hp) + p["b4"]
    # chan_out = tanh(r) is dead code in the reference forward
    r = jnp.dot(r, p["w5"], precision=hp) + p["b5"]
    r = jnp.tanh(r)
    return jnp.dot(r, p["w6"], precision=hp) + p["b6"]


def matched_reference_group(x, noise, blob, *, S, C, F, v_rows):
    """Pure-JAX reference matching the kernel's numerics (same packed bf16 blob,
    same folded lin4·lin5, bf16 dot operands, f32 elementwise)."""
    f32, bf16 = jnp.float32, jnp.bfloat16
    W_ROWS = 5 * F
    vecs = blob[W_ROWS:W_ROWS + v_rows, :].astype(f32)
    wc0, wc1 = vecs[0:1], vecs[1:2]
    b1, b2, b3, bc = vecs[2:3], vecs[3:4], vecs[4:5], vecs[5:6]
    gamma, beta = vecs[6:7], vecs[7:8]
    b45, b6 = vecs[8:9], vecs[9:10]

    def dot(a, w):
        return jnp.dot(a.astype(bf16), w, preferred_element_type=f32)

    B = x.shape[0]
    xp = jnp.zeros((B, F), f32).at[:, :S].set(x)
    npad = jnp.zeros((B, F), f32).at[:, :C].set(noise)

    h = jnp.tanh(dot(xp[:, 0:S], blob[0:S, :]) + b1)
    h = jnp.tanh(dot(h, blob[F:2 * F, :]) + b2)
    h = jnp.tanh(dot(h, blob[2 * F:3 * F, :]) + b3)
    c = h[:, 0:1] * wc0 + h[:, 1:2] * wc1 + bc
    mean = jnp.mean(c, axis=0, keepdims=True)
    d = c - mean
    var = jnp.mean(d * d, axis=0, keepdims=True)
    c = jnp.tanh(d * lax.rsqrt(var + 1e-5) * gamma + beta)
    chan = c + npad
    r = jnp.tanh(dot(chan, blob[3 * F:4 * F, :]) + b45)
    y = dot(r, blob[4 * F:5 * F, :]) + b6
    return y[:, :S]


def _linear_params(key, fan_in, fan_out, dtype=jnp.float32):
    """PyTorch nn.Linear default init, weight stored transposed as (in, out)."""
    kw, kb = jax.random.split(key)
    bound = 1.0 / np.sqrt(fan_in)
    w = jax.random.uniform(kw, (fan_in, fan_out), dtype, -bound, bound)
    b = jax.random.uniform(kb, (1, fan_out), dtype, -bound, bound)
    return w, b


if __name__ == "__main__":
    # Small, module-consistent shapes: comm_16_1 -> 16 symbols, 1 channel use.
    num_sym, num_chan, hidden = 16, 1, 32
    rate, train_snr = 1.0, 7
    Ebno = 10.0 ** (train_snr / 10.0)
    std_dev = float(np.sqrt(1.0 / (2.0 * Ebno * rate)))

    S, H, C = num_sym, hidden, 2 * num_chan
    F = max(S, H, C)          # uniform padded feature width (= 32)
    V_ROWS = 16               # 10 used vector rows, padded to a bf16 tile
    N, B = 4, 32              # 4 independent batch groups of 32 (grid axis)

    root = jax.random.PRNGKey(0)
    keys = jax.random.split(root, 9)

    w1, b1 = _linear_params(keys[0], S, S)
    w2, b2 = _linear_params(keys[1], S, H)
    w3, b3 = _linear_params(keys[2], H, 2)
    wc, bc = _linear_params(keys[3], 2, C)
    w4, b4 = _linear_params(keys[4], C, H)
    w5, b5 = _linear_params(keys[5], H, S)
    w6, b6 = _linear_params(keys[6], S, S)

    params = dict(
        w1=w1, b1=b1, w2=w2, b2=b2, w3=w3, b3=b3, wc=wc, bc=bc,
        gamma=jnp.ones((1, C), jnp.float32),   # BatchNorm1d default weight
        beta=jnp.zeros((1, C), jnp.float32),   # BatchNorm1d default bias
        w4=w4, b4=b4, w5=w5, b5=b5, w6=w6, b6=b6,
    )

    # Pack once; the single bf16 blob stays resident across all grid steps.
    blob = pack_params(params, S=S, H=H, C=C, F=F, v_rows=V_ROWS)

    # One-hot inputs, typical for this autoencoder, for N independent batches.
    sym = jax.random.randint(keys[7], (N, B), 0, num_sym)
    x = jax.nn.one_hot(sym, num_sym, dtype=jnp.float32)          # (N, B, S)

    # Deterministic Gaussian channel noise.
    noise = std_dev * jax.random.normal(keys[8], (N, B, C), jnp.float32)

    forward = jax.jit(functools.partial(
        comm_16_1_forward, S=S, C=C, F=F, v_rows=V_ROWS))
    out = forward(x, noise, blob)
    jax.block_until_ready(out)

    assert out.shape == (N, B, S) and out.dtype == jnp.float32

    # Structural check: matched-precision JAX reference (same bf16 blob, same
    # fold, same op order) — tight tolerance; only MXU/XLA accumulation-order
    # and transcendental-impl differences remain.
    ref_m = jax.vmap(lambda xb, nb: matched_reference_group(
        xb, nb, blob, S=S, C=C, F=F, v_rows=V_ROWS))(x, noise)
    err_m = float(jnp.max(jnp.abs(out - ref_m)))
    assert err_m < 5e-3, f"kernel vs matched-precision reference: max abs err {err_m}"

    # End-to-end check vs the unfolded f32 HIGHEST-precision reference (loose:
    # bf16 MXU operands + the offline lin4/lin5 fold differ only by rounding).
    ref_f = jax.vmap(lambda xb, nb: reference_forward_group(xb, params, nb))(x, noise)
    err_f = float(jnp.max(jnp.abs(out - ref_f)))
    assert err_f < 1e-1, f"kernel vs f32 reference: max abs err {err_f}"

    print("KERNEL_OK")
</pallas_src>

<mosaic_0001>
module attributes {stable_mosaic.version = 11 : i64} {
  func.func @kernel(%arg0: i32, %arg1: memref<1x2x32x32xf32, #tpu.memory_space<vmem>>, %arg2: memref<176x32xbf16, #tpu.memory_space<vmem>>, %arg3: memref<1x32x32xf32, #tpu.memory_space<vmem>>) attributes {dimension_semantics = [#tpu.dimension_semantics<parallel>], iteration_bounds = array<i64: 4>, scalar_prefetch = 0 : i64, scratch_operands = 0 : i64, tpu.core_type = #tpu.core_type<tc>, window_params = [{transform_indices = @transform_0, window_bounds = array<i64: 1, 2, 32, 32>}, {pipeline_mode = #tpu.pipeline_mode<synchronous>, transform_indices = @transform_1, window_bounds = array<i64: 176, 32>}, {transform_indices = @transform_2, window_bounds = array<i64: 1, 32, 32>}]} {
    %c0 = arith.constant 0 : index
    %c0_0 = arith.constant 0 : index
    %c0_1 = arith.constant 0 : index
    %c0_2 = arith.constant 0 : index
    %0 = vector.load %arg1[%c0, %c0_0, %c0_1, %c0_2] : memref<1x2x32x32xf32, #tpu.memory_space<vmem>>, vector<1x1x32x32xf32>
    %1 = vector.shape_cast %0 : vector<1x1x32x32xf32> to vector<32x32xf32>
    %c0_3 = arith.constant 0 : index
    %c1 = arith.constant 1 : index
    %c0_4 = arith.constant 0 : index
    %c0_5 = arith.constant 0 : index
    %2 = vector.load %arg1[%c0_3, %c1, %c0_4, %c0_5] : memref<1x2x32x32xf32, #tpu.memory_space<vmem>>, vector<1x1x32x32xf32>
    %3 = vector.shape_cast %2 : vector<1x1x32x32xf32> to vector<32x32xf32>
    %c160 = arith.constant 160 : index
    %c0_6 = arith.constant 0 : index
    %4 = vector.load %arg2[%c160, %c0_6] : memref<176x32xbf16, #tpu.memory_space<vmem>>, vector<16x32xbf16>
    %5 = arith.extf %4 : vector<16x32xbf16> to vector<16x32xf32>
    %6 = vector.extract_strided_slice %5 {offsets = [0, 0], sizes = [1, 32], strides = [1, 1]} : vector<16x32xf32> to vector<1x32xf32>
    %7 = vector.extract_strided_slice %5 {offsets = [1, 0], sizes = [1, 32], strides = [1, 1]} : vector<16x32xf32> to vector<1x32xf32>
    %8 = vector.extract_strided_slice %5 {offsets = [2, 0], sizes = [1, 32], strides = [1, 1]} : vector<16x32xf32> to vector<1x32xf32>
    %9 = vector.extract_strided_slice %5 {offsets = [3, 0], sizes = [1, 32], strides = [1, 1]} : vector<16x32xf32> to vector<1x32xf32>
    %10 = vector.extract_strided_slice %5 {offsets = [4, 0], sizes = [1, 32], strides = [1, 1]} : vector<16x32xf32> to vector<1x32xf32>
    %11 = vector.extract_strided_slice %5 {offsets = [5, 0], sizes = [1, 32], strides = [1, 1]} : vector<16x32xf32> to vector<1x32xf32>
    %12 = vector.extract_strided_slice %5 {offsets = [6, 0], sizes = [1, 32], strides = [1, 1]} : vector<16x32xf32> to vector<1x32xf32>
    %13 = vector.extract_strided_slice %5 {offsets = [7, 0], sizes = [1, 32], strides = [1, 1]} : vector<16x32xf32> to vector<1x32xf32>
    %14 = vector.extract_strided_slice %5 {offsets = [8, 0], sizes = [1, 32], strides = [1, 1]} : vector<16x32xf32> to vector<1x32xf32>
    %15 = vector.extract_strided_slice %5 {offsets = [9, 0], sizes = [1, 32], strides = [1, 1]} : vector<16x32xf32> to vector<1x32xf32>
    %16 = vector.extract_strided_slice %1 {offsets = [0, 0], sizes = [32, 16], strides = [1, 1]} : vector<32x32xf32> to vector<32x16xf32>
    %c0_7 = arith.constant 0 : index
    %c0_8 = arith.constant 0 : index
    %17 = vector.load %arg2[%c0_7, %c0_8] : memref<176x32xbf16, #tpu.memory_space<vmem>>, vector<16x32xbf16>
    %18 = arith.truncf %16 : vector<32x16xf32> to vector<32x16xbf16>
    %cst = arith.constant dense<0.000000e+00> : vector<32x32xf32>
    %19 = tpu.matmul %18, %17, %cst {dimension_numbers = #tpu.dot_dimension_numbers<[1], [0], [0], [1], [0, 0, 1, 1], [], []>} : vector<32x16xbf16>, vector<16x32xbf16>, vector<32x32xf32> -> vector<32x32xf32>
    %20 = vector.broadcast %8 : vector<1x32xf32> to vector<32x32xf32>
    %21 = arith.addf %19, %20 : vector<32x32xf32>
    %22 = math.tanh %21 : vector<32x32xf32>
    %c32 = arith.constant 32 : index
    %c0_9 = arith.constant 0 : index
    %23 = vector.load %arg2[%c32, %c0_9] : memref<176x32xbf16, #tpu.memory_space<vmem>>, vector<32x32xbf16>
    %24 = arith.truncf %22 : vector<32x32xf32> to vector<32x32xbf16>
    %cst_10 = arith.constant dense<0.000000e+00> : vector<32x32xf32>
    %25 = tpu.matmul %24, %23, %cst_10 {dimension_numbers = #tpu.dot_dimension_numbers<[1], [0], [0], [1], [0, 0, 1, 1], [], []>} : vector<32x32xbf16>, vector<32x32xbf16>, vector<32x32xf32> -> vector<32x32xf32>
    %26 = vector.broadcast %9 : vector<1x32xf32> to vector<32x32xf32>
    %27 = arith.addf %25, %26 : vector<32x32xf32>
    %28 = math.tanh %27 : vector<32x32xf32>
    %c64 = arith.constant 64 : index
    %c0_11 = arith.constant 0 : index
    %29 = vector.load %arg2[%c64, %c0_11] : memref<176x32xbf16, #tpu.memory_space<vmem>>, vector<32x32xbf16>
    %30 = arith.truncf %28 : vector<32x32xf32> to vector<32x32xbf16>
    %cst_12 = arith.constant dense<0.000000e+00> : vector<32x32xf32>
    %31 = tpu.matmul %30, %29, %cst_12 {dimension_numbers = #tpu.dot_dimension_numbers<[1], [0], [0], [1], [0, 0, 1, 1], [], []>} : vector<32x32xbf16>, vector<32x32xbf16>, vector<32x32xf32> -> vector<32x32xf32>
    %32 = vector.broadcast %10 : vector<1x32xf32> to vector<32x32xf32>
    %33 = arith.addf %31, %32 : vector<32x32xf32>
    %34 = math.tanh %33 : vector<32x32xf32>
    %35 = vector.extract_strided_slice %34 {offsets = [0, 0], sizes = [32, 1], strides = [1, 1]} : vector<32x32xf32> to vector<32x1xf32>
    %36 = vector.broadcast %35 : vector<32x1xf32> to vector<32x32xf32>
    %37 = vector.broadcast %6 : vector<1x32xf32> to vector<32x32xf32>
    %38 = arith.mulf %36, %37 : vector<32x32xf32>
    %39 = vector.extract_strided_slice %34 {offsets = [0, 1], sizes = [32, 1], strides = [1, 1]} : vector<32x32xf32> to vector<32x1xf32>
    %40 = vector.broadcast %39 : vector<32x1xf32> to vector<32x32xf32>
    %41 = vector.broadcast %7 : vector<1x32xf32> to vector<32x32xf32>
    %42 = arith.mulf %40, %41 : vector<32x32xf32>
    %43 = arith.addf %38, %42 : vector<32x32xf32>
    %44 = vector.broadcast %11 : vector<1x32xf32> to vector<32x32xf32>
    %45 = arith.addf %43, %44 : vector<32x32xf32>
    %cst_13 = arith.constant dense<0.000000e+00> : vector<32xf32>
    %46 = vector.multi_reduction <add>, %45, %cst_13 [0] : vector<32x32xf32> to vector<32xf32>
    %47 = vector.shape_cast %46 : vector<32xf32> to vector<1x32xf32>
    %cst_14 = arith.constant 3.200000e+01 : f32
    %48 = vector.broadcast %cst_14 : f32 to vector<1x32xf32>
    %49 = arith.divf %47, %48 : vector<1x32xf32>
    %50 = vector.broadcast %49 : vector<1x32xf32> to vector<32x32xf32>
    %51 = arith.subf %45, %50 : vector<32x32xf32>
    %52 = arith.mulf %51, %51 : vector<32x32xf32>
    %cst_15 = arith.constant dense<0.000000e+00> : vector<32xf32>
    %53 = vector.multi_reduction <add>, %52, %cst_15 [0] : vector<32x32xf32> to vector<32xf32>
    %54 = vector.shape_cast %53 : vector<32xf32> to vector<1x32xf32>
    %cst_16 = arith.constant 3.200000e+01 : f32
    %55 = vector.broadcast %cst_16 : f32 to vector<1x32xf32>
    %56 = arith.divf %54, %55 : vector<1x32xf32>
    %cst_17 = arith.constant 9.99999974E-6 : f32
    %57 = vector.broadcast %cst_17 : f32 to vector<1x32xf32>
    %58 = arith.addf %56, %57 : vector<1x32xf32>
    %59 = math.rsqrt %58 : vector<1x32xf32>
    %60 = vector.broadcast %59 : vector<1x32xf32> to vector<32x32xf32>
    %61 = arith.mulf %51, %60 : vector<32x32xf32>
    %62 = vector.broadcast %12 : vector<1x32xf32> to vector<32x32xf32>
    %63 = arith.mulf %61, %62 : vector<32x32xf32>
    %64 = vector.broadcast %13 : vector<1x32xf32> to vector<32x32xf32>
    %65 = arith.addf %63, %64 : vector<32x32xf32>
    %66 = math.tanh %65 : vector<32x32xf32>
    %67 = arith.addf %66, %3 : vector<32x32xf32>
    %c96 = arith.constant 96 : index
    %c0_18 = arith.constant 0 : index
    %68 = vector.load %arg2[%c96, %c0_18] : memref<176x32xbf16, #tpu.memory_space<vmem>>, vector<32x32xbf16>
    %69 = arith.truncf %67 : vector<32x32xf32> to vector<32x32xbf16>
    %cst_19 = arith.constant dense<0.000000e+00> : vector<32x32xf32>
    %70 = tpu.matmul %69, %68, %cst_19 {dimension_numbers = #tpu.dot_dimension_numbers<[1], [0], [0], [1], [0, 0, 1, 1], [], []>} : vector<32x32xbf16>, vector<32x32xbf16>, vector<32x32xf32> -> vector<32x32xf32>
    %71 = vector.broadcast %14 : vector<1x32xf32> to vector<32x32xf32>
    %72 = arith.addf %70, %71 : vector<32x32xf32>
    %73 = math.tanh %72 : vector<32x32xf32>
    %c128 = arith.constant 128 : index
    %c0_20 = arith.constant 0 : index
    %74 = vector.load %arg2[%c128, %c0_20] : memref<176x32xbf16, #tpu.memory_space<vmem>>, vector<32x32xbf16>
    %75 = arith.truncf %73 : vector<32x32xf32> to vector<32x32xbf16>
    %cst_21 = arith.constant dense<0.000000e+00> : vector<32x32xf32>
    %76 = tpu.matmul %75, %74, %cst_21 {dimension_numbers = #tpu.dot_dimension_numbers<[1], [0], [0], [1], [0, 0, 1, 1], [], []>} : vector<32x32xbf16>, vector<32x32xbf16>, vector<32x32xf32> -> vector<32x32xf32>
    %77 = vector.broadcast %15 : vector<1x32xf32> to vector<32x32xf32>
    %78 = arith.addf %76, %77 : vector<32x32xf32>
    %c0_22 = arith.constant 0 : index
    %c0_23 = arith.constant 0 : index
    %c0_24 = arith.constant 0 : index
    %79 = vector.load %arg3[%c0_22, %c0_23, %c0_24] : memref<1x32x32xf32, #tpu.memory_space<vmem>>, vector<1x32x32xf32>
    %80 = vector.shape_cast %79 : vector<1x32x32xf32> to vector<32x32xf32>
    %81 = vector.shape_cast %78 : vector<32x32xf32> to vector<1x32x32xf32>
    tpu.vector_store %arg3[%c0_22, %c0_23, %c0_24], %81 {strides = array<i32>} : memref<1x32x32xf32, #tpu.memory_space<vmem>>, vector<1x32x32xf32>,
    return
  }
  func.func @transform_0(%arg0: i32) -> (i32, i32, i32, i32) {
    %c0_i32 = arith.constant 0 : i32
    %c0_i32_0 = arith.constant 0 : i32
    %c0_i32_1 = arith.constant 0 : i32
    %c0_i32_2 = arith.constant 0 : i32
    return %arg0, %c0_i32, %c0_i32_0, %c0_i32_1 : i32, i32, i32, i32
  }
  func.func @transform_1(%arg0: i32) -> (i32, i32) {
    %c0_i32 = arith.constant 0 : i32
    %c0_i32_0 = arith.constant 0 : i32
    %c0_i32_1 = arith.constant 0 : i32
    return %c0_i32, %c0_i32_0 : i32, i32
  }
  func.func @transform_2(%arg0: i32) -> (i32, i32, i32) {
    %c0_i32 = arith.constant 0 : i32
    %c0_i32_0 = arith.constant 0 : i32
    %c0_i32_1 = arith.constant 0 : i32
    return %arg0, %c0_i32, %c0_i32_0 : i32, i32, i32
  }
}

</mosaic_0001>

<bundles_post_ra>
// kernel: comm_16_1_forward.1
= control target key start
LH: loop header
LB: loop body
LE: loop exit
PB: predicated region body
PF: predicated region fallthrough
CT: control target
= control target key end

     0   :  { %s930_s9 = smov 0   ;;  %s1043_s0 = inlined_call_operand.vmem [shape: f32[4,2,32,32], index: 0, kind: input, shape index: {}]   ;;  %s1044_s1 = inlined_call_operand.vmem [shape: bf16[176,32], index: 1, kind: input, shape index: {}]   ;;  %s1045_s2 = inlined_call_operand.vmem [shape: f32[4,32,32], index: 2, kind: output, shape index: {}]  }
   0x1 LB: > { %s743_s10 = sadd.s32 4294967295, %s911_s9   ;;  %p747_p0 = scmp.ge.s32.totalorder %s911_s9, 1  ;;  %s911_s9 = sphi %s930_s9, %s12_s9  }
   0x2   : > { %p112_p1 = scmp.lt.s32.totalorder %s911_s9, 5 }
   0x4   : > { %p113_p2 = pnand %p747_p0, %p112_p1 }
   0x5   : > { %p134_p3 = scmp.lt.s32.totalorder (!%p113_p2), %s743_s10, 3 }
   0x6   : > { %116 = sbr.rel (%p113_p2) target bundleno = 1311 (0x51f), region = 28 }
   0xb   : > { %v854_v0 = vld [vmem:[%s1044_s1] sm:$0xff]   ;;  %s1047_s10 = smov (!%p134_p3, %s743_s10), 3  ;;  %vm172_vm0 = vcmask 130048   ;;  %v855_v7 = vld [vmem:[%s1044_s1 + $0x18] sm:$0xff]   ;;  %v856_v8 = vld [vmem:[%s1044_s1 + $0x10] sm:$0xff]   ;;  %v162_v9 = vlaneseq  ;;  %vm254_vm1 = vcmask 261120  }
   0xc   : > { %803 = vmatprep.subr.bf16.mxu0 %v854_v0  ;;  %s777_s13 = sshll.u32 %s1047_s10, 6  ;;  %809 = vmatprep.subr.bf16.mxu1 %v855_v7  ;;  %v964_v11 = vld [vmem:[%s1044_s1 + $0x50] sm:$0xff]   ;;  %v857_v29 = vld [vmem:[%s1044_s1 + $0x28] sm:$0xff]   ;;  %v858_v30 = vld [vmem:[%s1044_s1 + $0x20] sm:$0xff]   ;;  %v913_v47 = vmov 1   ;;  %v914_v48 = vmov 0  }
   0xd   : > { %804 = vmatpush3.bf16.msra.mxu0 %v854_v0  ;;  %s947_s16 = scalar_lea.vmem %s1043_s0, %s777_s13  ;;  %810 = vmatpush3.bf16.msra.mxu1 %v855_v7  ;;  %v959_v10 = vshrl.u32 %v162_v9, 7  ;;  %v967_v12 = vunpack.c.l.bf16 %v964_v11  ;;  %v859_v63 = vld [vmem:[%s1044_s1 + $0x38] sm:$0xff]   ;;  %v860_v0 = vld [vmem:[%s1044_s1 + $0x30] sm:$0xff]   ;;  %s778_s7 = sshll.u32 %s1047_s10, 5 }
   0xe   : > { %v145_v1 = vld [vmem:[%s947_s16] sm:$0xff]  ;;  %v146_v2 = vld [vmem:[%s947_s16 + $0x8] sm:$0xff]  ;;  %v147_v3 = vld [vmem:[%s947_s16 + $0x10] sm:$0xff]  ;;  %811 = vmatprep.subr.bf16.mxu1 %v856_v8  ;;  %817 = vmatprep.subr.bf16.mxu0 %v857_v29  ;;  %s143_s12 = scalar_lea.vmem %s1045_s2, %s778_s7 }
   0xf   : > { %v160_v4 = vpack.c.bf16 %v146_v2, %v145_v1  ;;  %v148_v5 = vld [vmem:[%s947_s16 + $0x18] sm:$0xff]  ;;  %v164_v13 = vsub.s32 2, %v959_v10  ;;  %v240_v31 = vsub.s32 3, %v959_v10  ;;  %852 = vset.pattern.permute.xlu1 %v913_v47  ;;  %851 = vset.pattern.permute.xlu0 %v914_v48  ;;  %v322_v49 = vsub.s32 4, %v959_v10 }
  0x10   : > { %v161_v6 = vpack.c.bf16 %v148_v5, %v147_v3  ;;  %v441_v1 = vsub.s32 1, %v959_v10  ;;  %v417_v2 = vsub.s32 0, %v959_v10  ;;  %v453_v7 = vsub.s32 5, %v959_v10 }
  0x11   : > { %805 = vmatprep.mubr.msk.bf16.mxu0 %vm172_vm0, %v160_v4  ;;  %812 = vmatpush3.bf16.msra.mxu1 %v856_v8  ;;  %v165_v15 = vrot.slane %v967_v12, %v164_v13  ;;  %v241_v33 = vrot.slane %v967_v12, %v240_v31  ;;  %v323_v50 = vrot.slane %v967_v12, %v322_v49 }
  0x12   : > { %806 = vmatmul.mubr.msk.bf16.vlgmr.msra.gmra.mxu0 %vm172_vm0, %v161_v6  ;;  %825 = vmatprep.subr.bf16.mxu1 %v859_v63  ;;  %v442_v5 = vrot.slane %v967_v12, %v441_v1  ;;  %v418_v6 = vrot.slane %v967_v12, %v417_v2 }
  0x13   : > { %818 = vmatpush3.bf16.msra.mxu0 %v857_v29 }
  0x14   : > { %819 = vmatprep.subr.bf16.mxu0 %v858_v30 }
  0x17   : > { %820 = vmatpush3.bf16.msra.mxu0 %v858_v30 }
  0xd2   : > { %v807_v14 = vpop.f32.mrf.mxu0 }
  0xd3   : > { %v222_v20 = vadd.f32 %v807_v14, %v165_v15 }
  0xd4   : > { %v213_v16 = vpop.f32.mrf.mxu0 }
  0xd5   : > { %v214_v17 = vadd.f32 %v213_v16, %v165_v15 }
  0xd6   : > { %v808_v18 = vpop.f32.mrf.mxu0 }
  0xd7   : > { %v225_v19 = vadd.f32 %v808_v18, %v165_v15  ;;  %863 = vtanh.f32 %v214_v17 }
  0xd8   : > { %v216_v21 = vpop.f32.mrf.mxu0 }
  0xd9   : > { %v217_v22 = vadd.f32 %v216_v21, %v165_v15  ;;  %865 = vtanh.f32 %v225_v19 }
  0xdb   : > { %867 = vtanh.f32 %v217_v22 }
  0xdc   : > { %869 = vtanh.f32 %v222_v20  ;;  %v454_v20 = vrot.slane %v967_v12, %v453_v7 }
  0xe4   : > { %v864_v23 = vpop.eup %863 }
  0xe6   : > { %v866_v24 = vpop.eup %865 }
  0xe8   : > { %v868_v25 = vpop.eup %867 }
  0xe9   : > { %v870_v26 = vpop.eup %869  ;;  %v236_v27 = vpack.c.bf16 %v868_v25, %v864_v23 }
  0xea   : > { %v237_v28 = vpack.c.bf16 %v866_v24, %v870_v26 }
  0xeb   : > { %813 = vmatprep.mubr.msk.bf16.mxu1 %vm254_vm1, %v236_v27 }
  0xec   : > { %814 = vmatmul.mubr.msk.bf16.vlgmr.msra.gmra.mxu1 %vm254_vm1, %v237_v28 }
  0xed   : > { %826 = vmatpush3.bf16.msra.mxu1 %v859_v63 }
  0xee   : > { %827 = vmatprep.subr.bf16.mxu1 %v860_v0 }
  0xf1   : > { %828 = vmatpush3.bf16.msra.mxu1 %v860_v0 }
 0x1ac   : > { %v815_v32 = vpop.f32.mrf.mxu1 }
 0x1ad   : > { %v304_v38 = vadd.f32 %v815_v32, %v241_v33 }
 0x1ae   : > { %v295_v34 = vpop.f32.mrf.mxu1 }
 0x1af   : > { %v296_v35 = vadd.f32 %v295_v34, %v241_v33 }
 0x1b0   : > { %v816_v36 = vpop.f32.mrf.mxu1 }
 0x1b1   : > { %v307_v37 = vadd.f32 %v816_v36, %v241_v33  ;;  %871 = vtanh.f32 %v296_v35 }
 0x1b2   : > { %v298_v39 = vpop.f32.mrf.mxu1 }
 0x1b3   : > { %v299_v40 = vadd.f32 %v298_v39, %v241_v33  ;;  %873 = vtanh.f32 %v307_v37 }
 0x1b5   : > { %875 = vtanh.f32 %v299_v40 }
 0x1b6   : > { %877 = vtanh.f32 %v304_v38 }
 0x1be   : > { %v872_v41 = vpop.eup %871 }
 0x1c0   : > { %v874_v42 = vpop.eup %873 }
 0x1c2   : > { %v876_v43 = vpop.eup %875 }
 0x1c3   : > { %v878_v44 = vpop.eup %877  ;;  %v318_v45 = vpack.c.bf16 %v876_v43, %v872_v41 }
 0x1c4   : > { %v319_v46 = vpack.c.bf16 %v874_v42, %v878_v44 }
 0x1c5   : > { %821 = vmatprep.mubr.msk.bf16.mxu0 %vm254_vm1, %v318_v45 }
 0x1c6   : > { %822 = vmatmul.mubr.msk.bf16.vlgmr.msra.gmra.mxu0 %vm254_vm1, %v319_v46 }
 0x286   : > { %v823_v51 = vpop.f32.mrf.mxu0 }
 0x287   : > { %v385_v52 = vadd.f32 %v823_v51, %v323_v50 }
 0x288   : > { %v376_v53 = vpop.f32.mrf.mxu0 }
 0x289   : > { %879 = vtanh.f32 %v385_v52  ;;  %v377_v54 = vadd.f32 %v376_v53, %v323_v50 }
 0x28a   : > { %v824_v55 = vpop.f32.mrf.mxu0 }
 0x28b   : > { %881 = vtanh.f32 %v377_v54  ;;  %v388_v58 = vadd.f32 %v824_v55, %v323_v50 }
 0x28c   : > { %v379_v56 = vpop.f32.mrf.mxu0 }
 0x28d   : > { %v380_v57 = vadd.f32 %v379_v56, %v323_v50 }
 0x28f   : > { %883 = vtanh.f32 %v380_v57 }
 0x290   : > { %885 = vtanh.f32 %v388_v58 }
 0x296   : > { %v880_v59 = vpop.eup %879 }
 0x297   : > { %432 = vperm.xlu1 %852, %v880_v59   ;;  %407 = vperm.xlu0 %851, %v880_v59  }
 0x298   : > { %v882_v60 = vpop.eup %881 }
 0x29b   : > { %424 = vperm.xlu1 %852, %v882_v60   ;;  %397 = vperm.xlu0 %851, %v882_v60  }
 0x29c   : > { %v884_v61 = vpop.eup %883 }
 0x29d   : > { %v886_v62 = vpop.eup %885 }
 0x29f   : > { %428 = vperm.xlu1 %852, %v884_v61   ;;  %402 = vperm.xlu0 %851, %v884_v61  }
 0x2a3   : > { %436 = vperm.xlu1 %852, %v886_v62   ;;  %412 = vperm.xlu0 %851, %v886_v62  }
 0x2a7   : > { %853 = vset.pattern.permute.xlu0 %v913_v47 }
 0x312   : > { %v433_v3 = vpop.permute.xlu1 %432  ;;  %v408_v4 = vpop.permute.xlu0 %407 }
 0x313   : > { %v445_v13 = vmul.f32 %v442_v5, %v433_v3  ;;  %v421_v14 = vmul.f32 %v418_v6, %v408_v4 }
 0x315   : > { %v449_v21 = vadd.f32 %v445_v13, %v421_v14  ;;  %v512_v13 = vsub.s32 7, %v959_v10 }
 0x316   : > { %v425_v8 = vpop.permute.xlu1 %424  ;;  %v398_v9 = vpop.permute.xlu0 %397 }
 0x317   : > { %v443_v15 = vmul.f32 %v442_v5, %v425_v8  ;;  %v419_v16 = vmul.f32 %v418_v6, %v398_v9  ;;  %v457_v28 = vadd.f32 %v454_v20, %v449_v21  ;;  %v504_v9 = vsub.s32 6, %v959_v10 }
 0x319   : > { %v447_v17 = vadd.f32 %v443_v15, %v419_v16  ;;  %v462_v36 = vsel %vm254_vm1, %v457_v28, 0.0  ;;  %v505_v14 = vrot.slane %v967_v12, %v504_v9  ;;  %v513_v16 = vrot.slane %v967_v12, %v512_v13  ;;  %v754_v12 = vld [vmem:[%s947_s16 + $0x30] sm:$0xff] }
 0x31a   : > { %v429_v18 = vpop.permute.xlu1 %428  ;;  %v403_v19 = vpop.permute.xlu0 %402 }
 0x31b   : > { %v444_v22 = vmul.f32 %v442_v5, %v429_v18  ;;  %v420_v23 = vmul.f32 %v418_v6, %v403_v19  ;;  %v455_v24 = vadd.f32 %v454_v20, %v447_v17 }
 0x31d   : > { %v448_v25 = vadd.f32 %v444_v22, %v420_v23  ;;  %v459_v32 = vsel %vm254_vm1, %v455_v24, 0.0 }
 0x31e   : > { %v437_v26 = vpop.permute.xlu1 %436  ;;  %v413_v27 = vpop.permute.xlu0 %412 }
 0x31f   : > { %v456_v29 = vadd.f32 %v454_v20, %v448_v25  ;;  %v446_v30 = vmul.f32 %v442_v5, %v437_v26  ;;  %v422_v31 = vmul.f32 %v418_v6, %v413_v27 }
 0x321   : > { %v460_v33 = vsel %vm254_vm1, %v456_v29, 0.0  ;;  %v450_v34 = vadd.f32 %v446_v30, %v422_v31  ;;  %v752_v31 = vld [vmem:[%s947_s16 + $0x20] sm:$0xff] }
 0x322   : > { %v461_v35 = vadd.f32 %v460_v33, %v459_v32  ;;  %v753_v33 = vld [vmem:[%s947_s16 + $0x28] sm:$0xff] }
 0x323   : > { %v458_v37 = vadd.f32 %v454_v20, %v450_v34 }
 0x324   : > { %v463_v38 = vadd.f32 %v462_v36, %v461_v35 }
 0x325   : > { %v464_v39 = vsel %vm254_vm1, %v458_v37, 0.0 }
 0x326   : > { %v465_v40 = vadd.f32 %v464_v39, %v463_v38 }
 0x328   : > { %v466_v41 = vrot.slane %v465_v40, 4 }
 0x32a   : > { %v467_v42 = vadd.f32 %v466_v41, %v465_v40 }
 0x32c   : > { %v468_v43 = vrot.slane %v467_v42, 2 }
 0x32e   : > { %v469_v44 = vadd.f32 %v468_v43, %v467_v42  ;;  %v861_v42 = vld [vmem:[%s1044_s1 + $0x48] sm:$0xff]   ;;  %v862_v43 = vld [vmem:[%s1044_s1 + $0x40] sm:$0xff]  }
 0x32f   : > { %833 = vmatprep.subr.bf16.mxu0 %v861_v42 }
 0x330   : > { %v470_v45 = vrot.slane %v469_v44, 1  ;;  %834 = vmatpush3.bf16.msra.mxu0 %v861_v42 }
 0x331   : > { %835 = vmatprep.subr.bf16.mxu0 %v862_v43 }
 0x332   : > { %v471_v46 = vadd.f32 %v470_v45, %v469_v44  ;;  %v782_v44 = vunpack.c.h.bf16 %v964_v11 }
 0x334   : > { %v473_v47 = vmul.f32 0.03125, %v471_v46  ;;  %836 = vmatpush3.bf16.msra.mxu0 %v862_v43  ;;  %v535_v46 = vrot.slane %v782_v44, %v417_v2  ;;  %v616_v2 = vrot.slane %v782_v44, %v441_v1 }
 0x336   : > { %v474_v48 = vsub.f32 %v455_v24, %v473_v47  ;;  %v475_v49 = vsub.f32 %v456_v29, %v473_v47  ;;  %v476_v50 = vsub.f32 %v457_v28, %v473_v47  ;;  %v477_v51 = vsub.f32 %v458_v37, %v473_v47  ;;  %v755_v29 = vld [vmem:[%s947_s16 + $0x38] sm:$0xff] }
 0x338   : > { %v478_v52 = vmul.f32 %v474_v48, %v474_v48  ;;  %v479_v53 = vmul.f32 %v475_v49, %v475_v49  ;;  %v480_v54 = vmul.f32 %v476_v50, %v476_v50  ;;  %v481_v55 = vmul.f32 %v477_v51, %v477_v51 }
 0x33a   : > { %v482_v56 = vsel %vm254_vm1, %v478_v52, 0.0  ;;  %v483_v57 = vsel %vm254_vm1, %v479_v53, 0.0  ;;  %v485_v59 = vsel %vm254_vm1, %v480_v54, 0.0  ;;  %v487_v61 = vsel %vm254_vm1, %v481_v55, 0.0 }
 0x33b   : > { %v484_v58 = vadd.f32 %v483_v57, %v482_v56 }
 0x33d   : > { %v486_v60 = vadd.f32 %v485_v59, %v484_v58 }
 0x33f   : > { %v488_v62 = vadd.f32 %v487_v61, %v486_v60 }
 0x341   : > { %v489_v63 = vrot.slane %v488_v62, 4 }
 0x343   : > { %v490_v0 = vadd.f32 %v489_v63, %v488_v62 }
 0x345   : > { %v491_v3 = vrot.slane %v490_v0, 2 }
 0x347   : > { %v492_v4 = vadd.f32 %v491_v3, %v490_v0 }
 0x349   : > { %v493_v5 = vrot.slane %v492_v4, 1 }
 0x34b   : > { %v494_v6 = vadd.f32 %v493_v5, %v492_v4 }
 0x34d   : > { %v495_v7 = vmul.f32 0.03125, %v494_v6 }
 0x34f   : > { %v496_v8 = vadd.f32 1e-05, %v495_v7 }
 0x351   : > { %887 = vrsqrt.f32 %v496_v8 }
 0x35e   : > { %v888_v15 = vpop.eup %887 }
 0x35f   : > { %v498_v17 = vmul.f32 %v888_v15, %v474_v48  ;;  %v499_v18 = vmul.f32 %v888_v15, %v475_v49  ;;  %v500_v19 = vmul.f32 %v888_v15, %v476_v50  ;;  %v501_v20 = vmul.f32 %v888_v15, %v477_v51 }
 0x361   : > { %v506_v21 = vmul.f32 %v505_v14, %v498_v17  ;;  %v507_v22 = vmul.f32 %v505_v14, %v499_v18  ;;  %v508_v23 = vmul.f32 %v505_v14, %v500_v19  ;;  %v509_v24 = vmul.f32 %v505_v14, %v501_v20 }
 0x363   : > { %v516_v25 = vadd.f32 %v513_v16, %v508_v23  ;;  %v517_v26 = vadd.f32 %v513_v16, %v509_v24  ;;  %v514_v27 = vadd.f32 %v513_v16, %v506_v21  ;;  %v515_v28 = vadd.f32 %v513_v16, %v507_v22 }
 0x365   : > { %889 = vtanh.f32 %v516_v25 }
 0x366   : > { %891 = vtanh.f32 %v517_v26 }
 0x367   : > { %893 = vtanh.f32 %v514_v27 }
 0x368   : > { %895 = vtanh.f32 %v515_v28 }
 0x372   : > { %v890_v30 = vpop.eup %889 }
 0x373   : > { %v892_v32 = vpop.eup %891  ;;  %v524_v34 = vadd.f32 %v890_v30, %v754_v12 }
 0x374   : > { %v894_v35 = vpop.eup %893  ;;  %v525_v36 = vadd.f32 %v892_v32, %v755_v29 }
 0x375   : > { %v896_v37 = vpop.eup %895  ;;  %v522_v38 = vadd.f32 %v894_v35, %v752_v31 }
 0x376   : > { %v523_v39 = vadd.f32 %v896_v37, %v753_v33  ;;  %v531_v40 = vpack.c.bf16 %v525_v36, %v524_v34 }
 0x378   : > { %v530_v41 = vpack.c.bf16 %v523_v39, %v522_v38 }
 0x37a   : > { %829 = vmatprep.mubr.msk.bf16.mxu1 %vm254_vm1, %v530_v41 }
 0x37b   : > { %830 = vmatmul.mubr.msk.bf16.vlgmr.msra.gmra.mxu1 %vm254_vm1, %v531_v40 }
 0x43b   : > { %v831_v45 = vpop.f32.mrf.mxu1 }
 0x43c   : > { %v597_v51 = vadd.f32 %v831_v45, %v535_v46 }
 0x43d   : > { %v588_v47 = vpop.f32.mrf.mxu1 }
 0x43e   : > { %v589_v48 = vadd.f32 %v588_v47, %v535_v46 }
 0x43f   : > { %v832_v49 = vpop.f32.mrf.mxu1 }
 0x440   : > { %v600_v50 = vadd.f32 %v832_v49, %v535_v46  ;;  %897 = vtanh.f32 %v589_v48 }
 0x441   : > { %v591_v52 = vpop.f32.mrf.mxu1 }
 0x442   : > { %v592_v53 = vadd.f32 %v591_v52, %v535_v46  ;;  %899 = vtanh.f32 %v600_v50 }
 0x444   : > { %901 = vtanh.f32 %v592_v53 }
 0x445   : > { %903 = vtanh.f32 %v597_v51 }
 0x44d   : > { %v898_v54 = vpop.eup %897 }
 0x44f   : > { %v900_v55 = vpop.eup %899 }
 0x451   : > { %v902_v56 = vpop.eup %901 }
 0x452   : > { %v904_v11 = vpop.eup %903  ;;  %v611_v57 = vpack.c.bf16 %v902_v56, %v898_v54 }
 0x453   : > { %v612_v58 = vpack.c.bf16 %v900_v55, %v904_v11 }
 0x454   : > { %837 = vmatprep.mubr.msk.bf16.mxu0 %vm254_vm1, %v611_v57 }
 0x455   : > { %838 = vmatmul.mubr.msk.bf16.vlgmr.msra.gmra.mxu0 %vm254_vm1, %v612_v58 }
 0x515   : > { %v839_v59 = vpop.f32.mrf.mxu0 }
 0x516   : > { %v678_v60 = vadd.f32 %v839_v59, %v616_v2 }
 0x517   : > { %v669_v61 = vpop.f32.mrf.mxu0 }
 0x518   : > { %686 = vst.msk [vmem:[%s143_s12 + $0x10] sm:$0xff] %vm254_vm1, %v678_v60  ;;  %v670_v62 = vadd.f32 %v669_v61, %v616_v2 }
 0x519   : > { %v840_v63 = vpop.f32.mrf.mxu0 }
 0x51a   : > { %684 = vst.msk [vmem:[%s143_s12] sm:$0xff] %vm254_vm1, %v670_v62  ;;  %v681_v0 = vadd.f32 %v840_v63, %v616_v2 }
 0x51b   : > { %v672_v3 = vpop.f32.mrf.mxu0 }
 0x51c   : > { %687 = vst.msk [vmem:[%s143_s12 + $0x18] sm:$0xff] %vm254_vm1, %v681_v0  ;;  %v673_v4 = vadd.f32 %v672_v3, %v616_v2 }
 0x51e   : > { %685 = vst.msk [vmem:[%s143_s12 + $0x8] sm:$0xff] %vm254_vm1, %v673_v4 }
 0x51f PF: > { %s12_s9 = sadd.s32 1, %s911_s9  }
 0x520   : > { %p9_p4 = scmp.ge.s32.totalorder %s12_s9, 6  }
 0x522   :  { %11 = sbr.rel (!%p9_p4) target bundleno = 1 (0x1), region = 59 }

</bundles_post_ra>
